<compile_context>
chip_gen: v5e
topology: v5e:2x2
jax: 0.10.0
libtpu: 0.0.40
codegen_flags: <defaults>
</compile_context>

<pallas_src>
import functools

import jax
import jax.numpy as jnp
from jax import lax
from jax.experimental import pallas as pl
from jax.experimental.pallas import tpu as pltpu

ALPHA = 1.0
GAMMA = 2


def _focal_kernel_lane_dense(logits_ref, targets_ref, out_ref, *,
                             n_total, tn, alpha, gamma):
    """C < 128 path. logits_ref: (C, TN) native dtype (batch on lanes),
    targets_ref: (1, TN) int32, out_ref: (1, 1) f32 SMEM accumulator."""
    i = pl.program_id(0)
    x = logits_ref[...].astype(jnp.float32)                      # (C, TN)
    t = targets_ref[...]                                          # (1, TN)

    # numerically stable log-sum-exp over the class (sublane) axis
    m = jnp.max(x, axis=0, keepdims=True)                         # (1, TN)
    lse = m + jnp.log(jnp.sum(jnp.exp(x - m), axis=0, keepdims=True))

    # gather the target-class logit via a one-hot mask (no gather op needed)
    cls = lax.broadcasted_iota(jnp.int32, x.shape, 0)              # (C, TN)
    tgt = jnp.sum(jnp.where(cls == t, x, 0.0), axis=0, keepdims=True)

    ce = lse - tgt                                                 # (1, TN)
    pt = jnp.exp(-ce)
    focal = alpha * (1.0 - pt) ** gamma * ce                       # (1, TN)

    # mask lanes past the true batch size (final partial tile is padded with
    # unspecified data; jnp.where also stops NaN propagation from garbage)
    col = lax.broadcasted_iota(jnp.int32, focal.shape, 1) + i * tn
    focal = jnp.where(col < n_total, focal, 0.0)

    @pl.when(i == 0)
    def _():
        out_ref[0, 0] = 0.0

    out_ref[0, 0] += jnp.sum(focal)


def _focal_kernel_row_major(logits_ref, targets_ref, out_ref, *,
                            n_total, tn, alpha, gamma):
    """C >= 128 path. logits_ref: (TN, C) native dtype, targets_ref: (TN, 1)
    int32, out_ref: (1, 1) f32 SMEM accumulator."""
    i = pl.program_id(0)
    x = logits_ref[...].astype(jnp.float32)                       # (TN, C)
    t = targets_ref[...]                                           # (TN, 1)

    m = jnp.max(x, axis=-1, keepdims=True)                         # (TN, 1)
    lse = m + jnp.log(jnp.sum(jnp.exp(x - m), axis=-1, keepdims=True))

    cls = lax.broadcasted_iota(jnp.int32, x.shape, 1)               # (TN, C)
    tgt = jnp.sum(jnp.where(cls == t, x, 0.0), axis=-1, keepdims=True)

    ce = lse - tgt                                                  # (TN, 1)
    pt = jnp.exp(-ce)
    focal = alpha * (1.0 - pt) ** gamma * ce                        # (TN, 1)

    row = lax.broadcasted_iota(jnp.int32, focal.shape, 0) + i * tn
    focal = jnp.where(row < n_total, focal, 0.0)

    @pl.when(i == 0)
    def _():
        out_ref[0, 0] = 0.0

    out_ref[0, 0] += jnp.sum(focal)


def focal_loss(logits, targets, *, alpha=ALPHA, gamma=GAMMA,
               reduction="mean", max_block_rows=None):
    """Pallas TPU focal loss.  logits: (N, C) float (any dtype, incl. bf16),
    targets: (N,) integer class indices.  Scalar output for 'mean'/'sum'."""
    n, c = logits.shape
    targets = targets.astype(jnp.int32)
    dsize = jnp.dtype(logits.dtype).itemsize

    if c < 128:
        # Lane-dense layout: batch on the 128-lane axis, classes on sublanes.
        # The wrapper transpose is layout plumbing the producer can often fuse.
        cap = 2048 if max_block_rows is None else max_block_rows
        cap = max(128, (cap // 128) * 128)
        tn = n if n <= cap else cap
        grid = (pl.cdiv(n, tn),)
        kernel = functools.partial(_focal_kernel_lane_dense,
                                   n_total=n, tn=tn, alpha=alpha, gamma=gamma)
        operands = (logits.T, targets.reshape(1, n))
        in_specs = [
            pl.BlockSpec((c, tn), lambda i: (0, i)),
            pl.BlockSpec((1, tn), lambda i: (0, i)),
        ]
    else:
        # Row-major layout; keep double-buffered logits tile around <= 8 MiB.
        cap = (8 * 1024 * 1024) // (2 * c * dsize)
        cap = min(cap, 2048)
        if max_block_rows is not None:
            cap = min(cap, max_block_rows)
        cap = max(8, (cap // 8) * 8)
        tn = n if n <= cap else cap
        grid = (pl.cdiv(n, tn),)
        kernel = functools.partial(_focal_kernel_row_major,
                                   n_total=n, tn=tn, alpha=alpha, gamma=gamma)
        operands = (logits, targets.reshape(n, 1))
        in_specs = [
            pl.BlockSpec((tn, c), lambda i: (i, 0)),
            pl.BlockSpec((tn, 1), lambda i: (i, 0)),
        ]

    total = pl.pallas_call(
        kernel,
        out_shape=jax.ShapeDtypeStruct((1, 1), jnp.float32),
        grid=grid,
        in_specs=in_specs,
        out_specs=pl.BlockSpec(memory_space=pltpu.SMEM),
        compiler_params=pltpu.CompilerParams(
            dimension_semantics=("arbitrary",),   # running scalar accumulator
            vmem_limit_bytes=32 * 1024 * 1024,
        ),
        cost_estimate=pl.CostEstimate(
            flops=int(6 * n * c),
            transcendentals=int(n * c + 2 * n),
            bytes_accessed=int(n * c * dsize + n * 4 + 4),
        ),
    )(*operands)[0, 0]

    if reduction == "mean":
        return total / jnp.float32(n)
    elif reduction == "sum":
        return total
    # TODO(synk): reduction='none' needs a per-sample (N,) output; only the
    # module default 'mean' (and 'sum') are implemented here.
    raise NotImplementedError("reduction must be 'mean' or 'sum'")


def _focal_loss_ref(logits, targets, alpha=ALPHA, gamma=GAMMA):
    logp = jax.nn.log_softmax(logits.astype(jnp.float32), axis=-1)
    ce = -jnp.take_along_axis(logp, targets[:, None].astype(jnp.int32),
                              axis=-1)[:, 0]
    pt = jnp.exp(-ce)
    return jnp.mean(alpha * (1.0 - pt) ** gamma * ce)


if __name__ == "__main__":
    key = jax.random.PRNGKey(0)
    k1, k2, k3, k4 = jax.random.split(key, 4)

    # Path 1: small class count (C < 128) -> lane-dense layout.
    # N=300, block=128 -> 3-step grid with a masked partial final tile.
    N1, C1 = 300, 16
    logits1 = jax.random.normal(k1, (N1, C1), dtype=jnp.float32)
    targets1 = jax.random.randint(k2, (N1,), 0, C1, dtype=jnp.int32)
    loss1 = focal_loss(logits1, targets1, max_block_rows=128)
    jax.block_until_ready(loss1)
    ref1 = _focal_loss_ref(logits1, targets1)
    assert jnp.allclose(loss1, ref1, atol=1e-5, rtol=1e-5), (loss1, ref1)

    # Path 2: larger class count (C >= 128) -> row-major layout.
    # N=200, block=64 -> 4-step grid with a masked partial final tile.
    N2, C2 = 200, 160
    logits2 = jax.random.normal(k3, (N2, C2), dtype=jnp.float32)
    targets2 = jax.random.randint(k4, (N2,), 0, C2, dtype=jnp.int32)
    loss2 = focal_loss(logits2, targets2, max_block_rows=64)
    jax.block_until_ready(loss2)
    ref2 = _focal_loss_ref(logits2, targets2)
    assert jnp.allclose(loss2, ref2, atol=1e-5, rtol=1e-5), (loss2, ref2)

    print("KERNEL_OK")
</pallas_src>

<mosaic_0001>
module attributes {stable_mosaic.version = 11 : i64} {
  func.func @_focal_kernel_lane_dense(%arg0: i32, %arg1: memref<16x128xf32, #tpu.memory_space<vmem>>, %arg2: memref<1x128xi32, #tpu.memory_space<vmem>>, %arg3: memref<1x1xf32, #tpu.memory_space<smem>>) attributes {dimension_semantics = [#tpu.dimension_semantics<arbitrary>], iteration_bounds = array<i64: 3>, scalar_prefetch = 0 : i64, scratch_operands = 0 : i64, tpu.core_type = #tpu.core_type<tc>, window_params = [{transform_indices = @transform_0, window_bounds = array<i64: 16, 128>}, {transform_indices = @transform_1, window_bounds = array<i64: 1, 128>}, {transform_indices = @transform_2, window_bounds = array<i64: 1, 1>}]} {
    %c0 = arith.constant 0 : index
    %c0_0 = arith.constant 0 : index
    %0 = vector.load %arg1[%c0, %c0_0] : memref<16x128xf32, #tpu.memory_space<vmem>>, vector<16x128xf32>
    %c0_1 = arith.constant 0 : index
    %c0_2 = arith.constant 0 : index
    %1 = vector.load %arg2[%c0_1, %c0_2] : memref<1x128xi32, #tpu.memory_space<vmem>>, vector<1x128xi32>
    %cst = arith.constant dense<0xFF800000> : vector<128xf32>
    %2 = vector.multi_reduction <maximumf>, %0, %cst [0] : vector<16x128xf32> to vector<128xf32>
    %3 = vector.shape_cast %2 : vector<128xf32> to vector<1x128xf32>
    %4 = vector.broadcast %3 : vector<1x128xf32> to vector<16x128xf32>
    %5 = arith.subf %0, %4 : vector<16x128xf32>
    %6 = math.exp %5 : vector<16x128xf32>
    %cst_3 = arith.constant dense<0.000000e+00> : vector<128xf32>
    %7 = vector.multi_reduction <add>, %6, %cst_3 [0] : vector<16x128xf32> to vector<128xf32>
    %8 = vector.shape_cast %7 : vector<128xf32> to vector<1x128xf32>
    %9 = math.log %8 : vector<1x128xf32>
    %10 = arith.addf %3, %9 : vector<1x128xf32>
    %11 = tpu.iota {dimensions = array<i32: 0>} : vector<16x128xi32>
    %12 = vector.broadcast %1 : vector<1x128xi32> to vector<16x128xi32>
    %13 = arith.cmpi eq, %11, %12 : vector<16x128xi32>
    %cst_4 = arith.constant 0.000000e+00 : f32
    %14 = vector.broadcast %cst_4 : f32 to vector<16x128xf32>
    %15 = arith.select %13, %0, %14 : vector<16x128xi1>, vector<16x128xf32>
    %cst_5 = arith.constant dense<0.000000e+00> : vector<128xf32>
    %16 = vector.multi_reduction <add>, %15, %cst_5 [0] : vector<16x128xf32> to vector<128xf32>
    %17 = vector.shape_cast %16 : vector<128xf32> to vector<1x128xf32>
    %18 = arith.subf %10, %17 : vector<1x128xf32>
    %cst_6 = arith.constant 0.000000e+00 : f32
    %19 = vector.broadcast %cst_6 : f32 to vector<1x128xf32>
    %20 = arith.subf %19, %18 : vector<1x128xf32>
    %21 = math.exp %20 : vector<1x128xf32>
    %cst_7 = arith.constant 1.000000e+00 : f32
    %22 = vector.broadcast %cst_7 : f32 to vector<1x128xf32>
    %23 = arith.subf %22, %21 : vector<1x128xf32>
    %24 = arith.mulf %23, %23 : vector<1x128xf32>
    %cst_8 = arith.constant 1.000000e+00 : f32
    %25 = vector.broadcast %cst_8 : f32 to vector<1x128xf32>
    %26 = arith.mulf %25, %24 : vector<1x128xf32>
    %27 = arith.mulf %26, %18 : vector<1x128xf32>
    %28 = tpu.iota {dimensions = array<i32: 1>} : vector<1x128xi32>
    %c128_i32 = arith.constant 128 : i32
    %29 = arith.muli %arg0, %c128_i32 : i32
    %30 = vector.broadcast %29 : i32 to vector<1x128xi32>
    %31 = arith.addi %28, %30 : vector<1x128xi32>
    %c300_i32 = arith.constant 300 : i32
    %32 = vector.broadcast %c300_i32 : i32 to vector<1x128xi32>
    %33 = arith.cmpi slt, %31, %32 : vector<1x128xi32>
    %cst_9 = arith.constant 0.000000e+00 : f32
    %34 = vector.broadcast %cst_9 : f32 to vector<1x128xf32>
    %35 = arith.select %33, %27, %34 : vector<1x128xi1>, vector<1x128xf32>
    %c0_i32 = arith.constant 0 : i32
    %36 = arith.cmpi eq, %arg0, %c0_i32 : i32
    %37 = arith.extui %36 : i1 to i32
    %c0_i32_10 = arith.constant 0 : i32
    %38 = arith.cmpi ne, %37, %c0_i32_10 : i32
    scf.if %38 {
      %cst_16 = arith.constant 0.000000e+00 : f32
      %c0_17 = arith.constant 0 : index
      %c0_18 = arith.constant 0 : index
      %46 = memref.load %arg3[%c0_17, %c0_18] : memref<1x1xf32, #tpu.memory_space<smem>>
      memref.store %cst_16, %arg3[%c0_17, %c0_18] : memref<1x1xf32, #tpu.memory_space<smem>>
    } else {
    }
    %c0_11 = arith.constant 0 : index
    %c0_12 = arith.constant 0 : index
    %39 = memref.load %arg3[%c0_11, %c0_12] : memref<1x1xf32, #tpu.memory_space<smem>>
    %40 = vector.shape_cast %35 : vector<1x128xf32> to vector<1x1x128xf32>
    %cst_13 = arith.constant dense<0.000000e+00> : vector<1xf32>
    %41 = vector.multi_reduction <add>, %40, %cst_13 [1, 2] : vector<1x1x128xf32> to vector<1xf32>
    %42 = vector.shape_cast %41 : vector<1xf32> to vector<1x1x1xf32>
    %43 = vector.extract %42[0, 0, 0] : f32 from vector<1x1x1xf32>
    %44 = arith.addf %39, %43 : f32
    %c0_14 = arith.constant 0 : index
    %c0_15 = arith.constant 0 : index
    %45 = memref.load %arg3[%c0_14, %c0_15] : memref<1x1xf32, #tpu.memory_space<smem>>
    memref.store %44, %arg3[%c0_14, %c0_15] : memref<1x1xf32, #tpu.memory_space<smem>>
    return
  }
  func.func @transform_0(%arg0: i32) -> (i32, i32) {
    %c0_i32 = arith.constant 0 : i32
    %c0_i32_0 = arith.constant 0 : i32
    return %c0_i32, %arg0 : i32, i32
  }
  func.func @transform_1(%arg0: i32) -> (i32, i32) {
    %c0_i32 = arith.constant 0 : i32
    %c0_i32_0 = arith.constant 0 : i32
    return %c0_i32, %arg0 : i32, i32
  }
  func.func @transform_2(%arg0: i32) -> (i32, i32) {
    %c0_i32 = arith.constant 0 : i32
    %c0_i32_0 = arith.constant 0 : i32
    %c0_i32_1 = arith.constant 0 : i32
    return %c0_i32, %c0_i32_0 : i32, i32
  }
}

</mosaic_0001>

<bundles_post_ra>
// kernel: tpu_custom_call.1
= control target key start
LH: loop header
LB: loop body
LE: loop exit
PB: predicated region body
PF: predicated region fallthrough
CT: control target
= control target key end

     0   :  { %7 = vsyncpa [#allocation3], 0  ;;  %s687_s0 = inlined_call_operand.hbm [shape: f32[16,300], index: 0, kind: input, shape index: {}]   ;;  %s688_s1 = inlined_call_operand.hbm [shape: s32[1,300], index: 1, kind: input, shape index: {}]   ;;  %s689_s2 = inlined_call_operand.hbm [shape: f32[1,1], index: 2, kind: output, shape index: {}]  }
   0x1   :  { %9 = vsyncpa [#allocation3 + $0x1], 0 }
   0x2   :  { %10 = vsyncpa [#allocation6], 0 }
   0x3   :  { %12 = vsyncpa [#allocation6 + $0x1], 0 }
   0x4   :  { %13 = vsyncpa [#allocation4], 0  ;;  %s559_s9 = smov 0   ;;  %s561_s10 = smov 0  }
   0x5   :  { %s563_s11 = smov 0   ;;  %s565_s12 = smov 0  }
   0x6 LB: > { %s578_s13 = sadd.s32 4294967295, %s537_s12   ;;  %s581_s14 = sadd.s32 1, %s537_s12   ;;  %s537_s12 = sphi %s565_s12, %s697_s12   ;;  %s533_s11 = sphi %s563_s11, %s696_s11   ;;  %s529_s10 = sphi %s561_s10, %s695_s10   ;;  %s525_s9 = sphi %s559_s9, %s694_s9  }
   0x7   : > { %s23_s15 = ssub.s32 %s537_s12, %s581_s14  ;;  %s26_s16 = sadd.s32 1, %s533_s11 }
   0x8   : > { %p24_p0 = scmp.eq.s32.totalorder %s23_s15, 0  ;;  %p33_p1 = scmp.ne.s32.totalorder %s533_s11, %s529_s10 }
   0x9   : > { %p34_p2 = scmp.eq.s32.totalorder %s537_s12, 0  ;;  %p39_p3 = scmp.ne.s32.totalorder %s529_s10, %s525_s9 }
   0xa   : > { %s591_s17 = scalar_select %p24_p0, %s533_s11, %s26_s16  }
   0xb   : > { %p593_p4 = por %p34_p2, %p33_p1  ;;  %p40_p5 = scmp.eq.s32.totalorder %s578_s13, 0 }
   0xc   : > { %p371_p6 = scmp.lt.s32.totalorder %s537_s12, 3  ;;  %s606_s20 = sand.u32 1, %s533_s11  }
   0xd   : > { %p601_p7 = por %p40_p5, %p39_p3  ;;  %s342_s21 = sshll.u32 %s606_s20, 4 }
   0xe   : > { %s343_s22 = sshll.u32 %s537_s12, 3  ;;  %s114_s26 = scalar_lea.vmem [#allocation2], %s342_s21 }
   0xf   : > { %s118_s25 = scalar_lea.hbm %s687_s0, %s343_s22  ;;  %s121_s27 = sshll.u32 %s114_s26, 4  ;;  %s122_s27 = int_to_ptr.vmem [resolvable:$true] %s121_s27 }
  0x10   : > { %s119_s28 = sshll.u32 %s118_s25, 4  ;;  %p615_p8 = pnand %p371_p6, %p593_p4  ;;  %s120_s28 = int_to_ptr.hbm [resolvable:$true] %s119_s28 }
  0x11   : > { %s111_s30 = scalar_lea.sflag [#allocation3], %s606_s20  ;;  %s421_s3 = sshra.s32 %s120_s28, 4  ;;  %s422_s3 = int_to_ptr.hbm [resolvable:$true] %s421_s3 }
  0x12   : > { %s423_s4 = scalar_lea.hbm %s422_s3, 16  ;;  %p425_p10 = pneg %p615_p8 }
  0x13   : > { %p424_p9 = scmp.ne.s32.totalorder %s422_s3, %s423_s4  ;;  %s428_s7 = scalar_lea.hbm %s687_s0, 48 }
  0x14   : > { %p429_p13 = scmp.lt.s32.totalorder %s422_s3, %s687_s0  ;;  %p430_p0 = scmp.lt.s32.totalorder %s428_s7, %s423_s4 }
  0x15   : > { %p426_p11 = pnand %p425_p10, %p424_p9 }
  0x16   : > { %p431_p1 = por %p430_p0, %p429_p13 }
  0x17   : > { %p427_p12 = pneg %p426_p11 }
  0x19   : > { %p432_p2 = pnand %p431_p1, %p427_p12 }
  0x1b   : > { %435 = shalt.err (!%p432_p2)
}
  0x1c   : > { %s539_s15 = smov 384   ;;  %s540_s16 = smov 128  }
  0x1d   : > { %s541_s18 = smov 8   ;;  %p344_p3 = scmp.ge.s32.totalorder %s537_s12, 1 }
  0x1e   : > { %367 = dma.hbm_to_vmem [thread:$0]  (!%p615_p8), %s120_s28, 256, %s122_s27, %s111_s30, %s539_s15, %s540_s16, %s541_s18  }
  0x1f   : > { %p146_p4 = scmp.lt.s32.totalorder %s537_s12, 4  ;;  %s137_s24 = scalar_lea.hbm %s688_s1, %s537_s12 }
  0x20   : > { %s139_s25 = sshll.u32 %s137_s24, 4  ;;  %s134_s26 = scalar_lea.vmem [#allocation5], %s606_s20  ;;  %s140_s25 = int_to_ptr.hbm [resolvable:$true] %s139_s25 }
  0x21   : > { %p635_p6 = pnand %p344_p3, %p146_p4  ;;  %s141_s3 = sshll.u32 %s134_s26, 4  ;;  %s142_s3 = int_to_ptr.vmem [resolvable:$true] %s141_s3 }
  0x22   : > { %s132_s4 = scalar_lea.sflag [#allocation6], %s606_s20  ;;  %s451_s5 = sshra.s32 %s140_s25, 4  ;;  %s452_s5 = int_to_ptr.hbm [resolvable:$true] %s451_s5 }
  0x23   : > { %s453_s6 = scalar_lea.hbm %s452_s5, 1  ;;  %s458_s30 = scalar_lea.hbm %s688_s1, 3 }
  0x24   : > { %p454_p9 = scmp.ne.s32.totalorder %s452_s5, %s453_s6  ;;  %p459_p13 = scmp.lt.s32.totalorder %s452_s5, %s688_s1 }
  0x25   : > { %p460_p0 = scmp.lt.s32.totalorder %s458_s30, %s453_s6 }
  0x26   : > { %p456_p11 = pnand %p454_p9, %p425_p10 }
  0x27   : > { %p461_p1 = por %p460_p0, %p459_p13 }
  0x28   : > { %p457_p12 = pneg %p456_p11 }
  0x2a   : > { %p462_p2 = pnand %p461_p1, %p457_p12 }
  0x2c   : > { %465 = shalt.err (!%p462_p2)
}
  0x2d   : > { %370 = dma.hbm_to_vmem [thread:$0]  (!%p615_p8), %s140_s25, 16, %s142_s3, %s132_s4  }
  0x2e   : > { %150 = sbr.rel (%p635_p6) target bundleno = 312 (0x138), region = 28  ;;  %s152_s20 = sand.u32 (!%p635_p6), 1, %s529_s10  }
  0x2f   : > { %s345_s8 = sshll.u32 (!%p635_p6), %s152_s20, 4  ;;  %s153_s9 = scalar_lea.sflag (!%p635_p6), [#allocation3], %s152_s20 }
  0x30   : > { %s156_s15 = scalar_lea.vmem (!%p635_p6), [#allocation2], %s345_s8 }
  0x33   : > { %512 = dma.done.wait (%p601_p7), %s153_s9, 256  }
  0x34   : > { %514 = vsyncadd (%p601_p7), %s153_s9, 4294967040  ;;  %s163_s16 = scalar_lea.sflag [#allocation6], %s152_s20  ;;  %s165_s18 = scalar_lea.vmem [#allocation5], %s152_s20 }
  0x35   : > { %516 = dma.done.wait (%p601_p7), %s163_s16, 16  }
  0x36   : > { %518 = vsyncadd (%p601_p7), %s163_s16, 4294967280  ;;  %v186_v0 = vld [vmem:[%s156_s15] sm:$0xff]  ;;  %v187_v1 = vld [vmem:[%s156_s15 + $0x8] sm:$0xff]  ;;  %v212_v5 = vlaneseq  ;;  %s346_s19 = sshll.u32 %s578_s13, 7  ;;  %vm248_vm3 = vcmask 1040384   ;;  %s542_s29 = smov 0.0  }
  0x37   : > { %v189_v2 = vmax.f32 %v186_v0, %v187_v1  ;;  %v412_v12 = vld [vmem:[%s165_s18] ss:$0 sm:$0xff]  ;;  %v237_v42 = vstv %s346_s19  ;;  %359 = sst [smem:[#allocation7]] (%p40_p5), %s542_s29  ;;  %s268_s24 = sshll.u32 %s689_s2, 4  ;;  %s269_s24 = int_to_ptr.hbm [resolvable:$true] %s268_s24 }
  0x38   : > { %v213_v8 = vshrl.u32 %v212_v5, 7  ;;  %v235_v41 = vand.u32 127, %v212_v5  ;;  %s247_s21 = sld [smem:[#allocation7]]  ;;  %p373_p7 = scmp.eq.s32.totalorder %s578_s13, 2 }
  0x39   : > { %v190_v3 = vrot.slane %v189_v2, 4  ;;  %s543_s3 = smov [#allocation7]  }
  0x3a   : > { %v214_v11 = vadd.s32 8, %v213_v8  ;;  %vm216_vm0 = vcmp.eq.s32.totalorder %v213_v8, %v412_v12  ;;  %v238_v44 = vadd.s32 %v237_v42, %v235_v41 }
  0x3b   : > { %v191_v4 = vmax.f32 %v189_v2, %v190_v3  ;;  %v218_v17 = vsel %vm216_vm0, %v186_v0, 0.0 }
  0x3c   : > { %vm217_vm1 = vcmp.eq.s32.totalorder %v214_v11, %v412_v12  ;;  %vm239_vm2 = vcmp.lt.s32.totalorder %v238_v44, 300 }
  0x3d   : > { %v192_v6 = vrot.slane %v191_v4, 2  ;;  %v219_v18 = vsel %vm217_vm1, %v187_v1, 0.0 }
  0x3e   : > { %v220_v19 = vadd.f32 %v219_v18, %v218_v17 }
  0x3f   : > { %v193_v7 = vmax.f32 %v191_v4, %v192_v6 }
  0x40   : > { %v221_v23 = vrot.slane %v220_v19, 4 }
  0x41   : > { %v194_v9 = vrot.slane %v193_v7, 1 }
  0x42   : > { %v222_v26 = vadd.f32 %v221_v23, %v220_v19 }
  0x43   : > { %v195_v10 = vmax.f32 %v193_v7, %v194_v9 }
  0x44   : > { %v223_v29 = vrot.slane %v222_v26, 2 }
  0x45   : > { %v196_v13 = vsub.f32 %v186_v0, %v195_v10  ;;  %v197_v14 = vsub.f32 %v187_v1, %v195_v10 }
  0x46   : > { %v224_v32 = vadd.f32 %v223_v29, %v222_v26 }
  0x47   : > { %v198_v15 = vmul.f32 1.442695, %v196_v13  ;;  %v200_v16 = vmul.f32 1.442695, %v197_v14 }
  0x48   : > { %v225_v33 = vrot.slane %v224_v32, 1 }
  0x49   : > { %413 = vpow2.f32 %v198_v15 }
  0x4a   : > { %415 = vpow2.f32 %v200_v16  ;;  %v226_v36 = vadd.f32 %v225_v33, %v224_v32 }
  0x4f   : > { %v414_v20 = vpop.eup %413 }
  0x50   : > { %v416_v21 = vpop.eup %415 }
  0x51   : > { %v202_v22 = vadd.f32 %v416_v21, %v414_v20 }
  0x53   : > { %v203_v24 = vrot.slane %v202_v22, 4 }
  0x55   : > { %v204_v25 = vadd.f32 %v203_v24, %v202_v22 }
  0x57   : > { %v205_v27 = vrot.slane %v204_v25, 2 }
  0x59   : > { %v206_v28 = vadd.f32 %v205_v27, %v204_v25 }
  0x5b   : > { %v207_v30 = vrot.slane %v206_v28, 1 }
  0x5d   : > { %v208_v31 = vadd.f32 %v207_v30, %v206_v28 }
  0x5f   : > { %417 = vlog2.f32 %v208_v31 }
  0x65   : > { %v418_v34 = vpop.eup %417 }
  0x66   : > { %v210_v35 = vmul.f32 0.6931472, %v418_v34 }
  0x68   : > { %v211_v37 = vadd.f32 %v210_v35, %v195_v10 }
  0x6a   : > { %v227_v38 = vsub.f32 %v211_v37, %v226_v36 }
  0x6c   : > { %v228_v39 = vsub.f32 0.0, %v227_v38 }
  0x6e   : > { %v229_v40 = vmul.f32 1.442695, %v228_v39 }
  0x70   : > { %419 = vpow2.f32 %v229_v40 }
  0x76   : > { %v420_v43 = vpop.eup %419 }
  0x77   : > { %v231_v45 = vsub.f32 1.0, %v420_v43 }
  0x79   : > { %v232_v46 = vmul.f32 %v231_v45, %v231_v45 }
  0x7b   : > { %v233_v47 = vmul.f32 %v232_v46, %v227_v38 }
  0x7d   : > { %v240_v48 = vsel %vm239_vm2, %v233_v47, 0.0 }
  0x7e   : > { %v249_v49 = vsel %vm248_vm3, %v240_v48, 0.0 }
  0x7f   : > { %250 = vadd.xlane.f32.xlu0 %v249_v49 }
  0xf2   : > { %v251_v50 = vpop.xlane.xlu0 %250 }
  0xf3   : > { %v252_v51 = vrot.slane %v251_v50, 4 }
  0xf5   : > { %v253_v52 = vadd.f32 %v252_v51, %v251_v50 }
  0xf7   : > { %v254_v53 = vrot.slane %v253_v52, 2 }
  0xf9   : > { %v255_v54 = vadd.f32 %v254_v53, %v253_v52 }
  0xfb   : > { %v256_v55 = vrot.slane %v255_v54, 1 }
  0xfd   : > { %v257_v56 = vadd.f32 %v256_v55, %v255_v54 }
  0xff   : > { %352 = vpush %v257_v56 }
 0x130   : > { %s353_s25 = spop %352 }
 0x131   : > { %s259_s26 = sadd.f32 %s353_s25, %s247_s21 }
 0x133   : > { %261 = sst [smem:[#allocation7]] %s259_s26 }
 0x134   : > { %361 = dma.smem_to_hbm (%p373_p7), %s543_s3, 16, %s269_s24, [#allocation4]  }
 0x135   : > { %520 = dma.done.wait (%p373_p7), [#allocation4], 16  }
 0x136   : > { %522 = vsyncadd (%p373_p7), [#allocation4], 4294967280 }
 0x137   : > { %277 = sfence }
 0x138 PF: > { %p16_p5 = scmp.ge.s32.totalorder %s581_s14, 5   ;;  %s694_s9 = smov %s529_s10 }
 0x139   : > { %s695_s10 = smov %s533_s11  ;;  %s696_s11 = smov %s591_s17 }
 0x13a   : > { %s697_s12 = smov %s581_s14  ;;  %18 = sbr.rel (!%p16_p5) target bundleno = 6 (0x6), region = 84 }
 0x13f   :  { %283 = vsyncpa [#allocation3], 1 }
 0x140   :  { %285 = vsyncpa [#allocation3 + $0x1], 1 }
 0x141   :  { %286 = vsyncpa [#allocation6], 1 }
 0x142   :  { %288 = vsyncpa [#allocation6 + $0x1], 1 }
 0x143   :  { %289 = vsyncpa [#allocation4], 1 }
 0x144   :  { %291 = vsyncpa [#allocation4 + $0x1], 1 }

</bundles_post_ra>
